<compile_context>
chip_gen: v7x
topology: tpu7x:2x2x1
jax: 0.10.0
libtpu: 0.0.40
codegen_flags: <defaults>
</compile_context>

<pallas_src>
import functools

import jax
import jax.numpy as jnp
from jax import lax
from jax.experimental import pallas as pl
from jax.experimental.pallas import tpu as pltpu


def _round_up(x, m):
    return ((x + m - 1) // m) * m


# ------------------------------- kernel -------------------------------------

def _fused_conv_kernel(x_ref, w1_ref, b1_ref, w2_ref, b2_ref, o_ref):
    """Fused conv1+ReLU+pool1 -> conv2+ReLU+pool2 -> flatten, all in VMEM.

    x_ref : (B, 128)       raw images (pixel = row*10 + col), zero-padded K
    w1_ref: (128, 1536)    conv1 lowered to one dense matmul; columns are four
                           384-wide groups, one per 2x2-pool-window position
                           (di,dj); inside a group: (ph, pw, c1), cols 320:384 = 0
    b1_ref: (1, 384)       conv1 bias tiled over the 16 pooled positions, pad = 0
    w2_ref: (384, 128)     conv2 lowered to one dense matmul; columns are four
                           32-wide groups, one per conv2 output position (== the
                           single pool-2 window); lanes 30:32 of each group = 0
    b2_ref: (1, 128)       conv2 bias tiled into each 32-lane group
    o_ref : (B, 128)       lane-dense output; lanes 0:30 are the module output
    """
    x = x_ref[...]

    # ---- stage 1: one wide dot; pool = running max of vreg-aligned slices ----
    z1 = jnp.dot(x, w1_ref[...], preferred_element_type=jnp.float32)   # (B,1536)
    m1 = z1[:, 0:384]
    m1 = jnp.maximum(m1, z1[:, 384:768])
    m1 = jnp.maximum(m1, z1[:, 768:1152])
    m1 = jnp.maximum(m1, z1[:, 1152:1536])
    # bias + ReLU hoisted after the max (monotonic); pad lanes stay exactly 0.
    y1 = jnp.maximum(m1 + b1_ref[...], 0.0).astype(w2_ref.dtype)       # (B,384)

    # ---- stage 2: one dot; 2x2 pool = lane-group max via XLU rolls -----------
    z2 = jnp.dot(y1, w2_ref[...], preferred_element_type=jnp.float32)  # (B,128)
    m2 = jnp.maximum(z2, pltpu.roll(z2, shift=32, axis=1))
    m2 = jnp.maximum(m2, pltpu.roll(m2, shift=64, axis=1))
    o_ref[...] = jnp.maximum(m2 + b2_ref[...], 0.0).astype(o_ref.dtype)


# --------------------- weight lowering (tiny, wrapper-side) ------------------

def _lower_conv1_weights(w1, compute_dtype):
    # w1: (20, 1, 3, 3).  Slab[(di,dj)][u*10+v, (ph*4+pw)*20 + c] = w1[c,0,i,j]
    # where u = 2*ph + di + i, v = 2*pw + dj + j.  Then pad K 100->128,
    # N 320->384, and concatenate the 4 slabs along N -> (128, 1536).
    w1c = w1[:, 0, :, :].astype(jnp.float32)                      # (20, 3, 3)
    u = jnp.arange(10)[None, :, None, None]
    ph = jnp.arange(4)[None, None, :, None]
    d = jnp.arange(2)[:, None, None, None]
    i = jnp.arange(3)[None, None, None, :]
    sel = (u == 2 * ph + d + i).astype(jnp.float32)               # (2, 10, 4, 3)
    w1_big = jnp.einsum('aupi,bvqj,cij->abuvpqc', sel, sel, w1c)  # (2,2,10,10,4,4,20)
    w1_big = w1_big.reshape(4, 100, 320)
    w1_big = jnp.pad(w1_big, ((0, 0), (0, 28), (0, 64)))          # (4, 128, 384)
    w1_big = jnp.transpose(w1_big, (1, 0, 2)).reshape(128, 4 * 384)
    return w1_big.astype(compute_dtype)


def _lower_conv2_weights(w2, compute_dtype):
    # w2: (30, 20, 3, 3).  Slab[(oh,ow)][(ph*4+pw)*20 + c1, c2] = w2[c2,c1,i,j]
    # where ph = oh + i, pw = ow + j.  Then pad K 320->384, N 30->32, and
    # concatenate the 4 slabs along N -> (384, 128).  Pad columns are exact 0.
    ph = jnp.arange(4)[None, :, None]
    oh = jnp.arange(2)[:, None, None]
    i = jnp.arange(3)[None, None, :]
    sel = (ph == oh + i).astype(jnp.float32)                      # (2, 4, 3)
    w2_big = jnp.einsum('api,bqj,dcij->abpqcd', sel, sel,
                        w2.astype(jnp.float32))                   # (2,2,4,4,20,30)
    w2_big = w2_big.reshape(4, 320, 30)
    w2_big = jnp.pad(w2_big, ((0, 0), (0, 64), (0, 2)))           # (4, 384, 32)
    w2_big = jnp.transpose(w2_big, (1, 0, 2)).reshape(384, 4 * 32)
    return w2_big.astype(compute_dtype)


# ------------------------------- wrapper -------------------------------------

@functools.partial(jax.jit, static_argnames=("block_n", "compute_dtype"))
def convolution_forward(x, params, *, block_n=2048, compute_dtype=jnp.bfloat16):
    """Pallas implementation of Convolution.forward.

    x: (N, 10, 10, 1) float32 (NHWC) -> (N, 30) float32.
    compute_dtype=bfloat16 (default) uses bf16 MXU passes with f32 accumulation;
    pass jnp.float32 for a high-precision path.
    """
    N = x.shape[0]
    assert x.shape[1:] == (10, 10, 1), x.shape

    # Lane-dense input: pad the 100-pixel contraction dim to 128.
    x_flat = jnp.pad(x.reshape(N, 100), ((0, 0), (0, 28))).astype(compute_dtype)

    w1_big = _lower_conv1_weights(params["w1"], compute_dtype)    # (128, 1536)
    w2_big = _lower_conv2_weights(params["w2"], compute_dtype)    # (384, 128)
    b1_big = jnp.pad(jnp.tile(params["b1"].astype(jnp.float32), 16),
                     (0, 64)).reshape(1, 384)
    b2_big = jnp.tile(jnp.pad(params["b2"].astype(jnp.float32), (0, 2)),
                      4).reshape(1, 128)

    # Batch block: multiple of 8 rows; balance tiles and force >= 2 grid steps
    # when possible (v7x megacore).  At blk=2048 the VMEM working set is ~24 MB
    # (dominated by the (blk,1536) f32 stage-1 product) -- well under the
    # 48 MiB request, which itself fits v7x's 64 MiB VMEM.
    blk_cap = _round_up(max(block_n, 8), 8)
    num_tiles = max(-(-N // blk_cap), 2)
    blk = max(_round_up(-(-N // num_tiles), 8), 8)
    n_pad = _round_up(N, blk)
    if n_pad != N:
        x_flat = jnp.pad(x_flat, ((0, n_pad - N), (0, 0)))

    out = pl.pallas_call(
        _fused_conv_kernel,
        out_shape=jax.ShapeDtypeStruct((n_pad, 128), jnp.float32),
        grid=(n_pad // blk,),
        in_specs=[
            pl.BlockSpec((blk, 128), lambda i: (i, 0)),
            pl.BlockSpec((128, 1536), lambda i: (0, 0)),   # resident
            pl.BlockSpec((1, 384), lambda i: (0, 0)),      # resident
            pl.BlockSpec((384, 128), lambda i: (0, 0)),    # resident
            pl.BlockSpec((1, 128), lambda i: (0, 0)),      # resident
        ],
        out_specs=pl.BlockSpec((blk, 128), lambda i: (i, 0)),
        compiler_params=pltpu.CompilerParams(
            dimension_semantics=("parallel",),
            vmem_limit_bytes=48 * 1024 * 1024),
    )(x_flat, w1_big, b1_big, w2_big, b2_big)

    # Lane-dense kernel store; the narrow (N, 30) contract is a cheap XLA slice.
    return out[:N, :30]


# ------------------------------ reference ------------------------------------

def _reference(x, params):
    # Pure-JAX reference of the same forward pass (XLA conv), for verification.
    w1, b1, w2, b2 = params["w1"], params["b1"], params["w2"], params["b2"]
    dn = ("NCHW", "OIHW", "NCHW")
    hp = lax.Precision.HIGHEST
    y = jnp.transpose(x, (0, 3, 1, 2))
    y = lax.conv_general_dilated(y, w1, (1, 1), "VALID",
                                 dimension_numbers=dn, precision=hp)
    y = jax.nn.relu(y + b1[None, :, None, None])
    y = lax.reduce_window(y, -jnp.inf, lax.max, (1, 1, 2, 2), (1, 1, 2, 2), "VALID")
    y = lax.conv_general_dilated(y, w2, (1, 1), "VALID",
                                 dimension_numbers=dn, precision=hp)
    y = jax.nn.relu(y + b2[None, :, None, None])
    y = lax.reduce_window(y, -jnp.inf, lax.max, (1, 1, 2, 2), (1, 1, 2, 2), "VALID")
    return y.reshape(y.shape[0], -1)


if __name__ == "__main__":
    key = jax.random.PRNGKey(0)
    kx, k1, k2, k3, k4 = jax.random.split(key, 5)
    N = 10
    x = jax.random.normal(kx, (N, 10, 10, 1), dtype=jnp.float32)
    # Deterministic synthetic parameters (shapes from nn.Conv2d(1,20,3) / (20,30,3)).
    params = {
        "w1": 0.1 * jax.random.normal(k1, (20, 1, 3, 3), dtype=jnp.float32),
        "b1": 0.1 * jax.random.normal(k2, (20,), dtype=jnp.float32),
        "w2": 0.1 * jax.random.normal(k3, (30, 20, 3, 3), dtype=jnp.float32),
        "b2": 0.1 * jax.random.normal(k4, (30,), dtype=jnp.float32),
    }

    ref = jax.block_until_ready(_reference(x, params))

    # Small block so the test exercises a multi-step parallel grid + batch padding.
    out_bf16 = jax.block_until_ready(convolution_forward(x, params, block_n=8))
    out_f32 = jax.block_until_ready(
        convolution_forward(x, params, block_n=8, compute_dtype=jnp.float32))

    assert out_bf16.shape == (N, 30), out_bf16.shape
    assert out_f32.shape == (N, 30), out_f32.shape
    err_f32 = float(jnp.max(jnp.abs(out_f32 - ref)))
    err_bf16 = float(jnp.max(jnp.abs(out_bf16 - ref)))
    # f32 path covers MXU f32-pass precision differences vs. the XLA conv
    # reference; bf16 path additionally tolerates bf16 input/weight rounding.
    assert err_f32 < 2e-2, err_f32
    assert err_bf16 < 7e-2, err_bf16
    print("KERNEL_OK")
</pallas_src>

<mosaic_0001>
module attributes {stable_mosaic.version = 11 : i64} {
  func.func @_fused_conv_kernel(%arg0: i32, %arg1: memref<8x128xbf16, #tpu.memory_space<vmem>>, %arg2: memref<128x1536xbf16, #tpu.memory_space<vmem>>, %arg3: memref<1x384xf32, #tpu.memory_space<vmem>>, %arg4: memref<384x128xbf16, #tpu.memory_space<vmem>>, %arg5: memref<1x128xf32, #tpu.memory_space<vmem>>, %arg6: memref<8x128xf32, #tpu.memory_space<vmem>>) attributes {dimension_semantics = [#tpu.dimension_semantics<parallel>], iteration_bounds = array<i64: 2>, scalar_prefetch = 0 : i64, scratch_operands = 0 : i64, tpu.core_type = #tpu.core_type<tc>, window_params = [{transform_indices = @transform_0, window_bounds = array<i64: 8, 128>}, {pipeline_mode = #tpu.pipeline_mode<synchronous>, transform_indices = @transform_1, window_bounds = array<i64: 128, 1536>}, {pipeline_mode = #tpu.pipeline_mode<synchronous>, transform_indices = @transform_2, window_bounds = array<i64: 1, 384>}, {pipeline_mode = #tpu.pipeline_mode<synchronous>, transform_indices = @transform_3, window_bounds = array<i64: 384, 128>}, {pipeline_mode = #tpu.pipeline_mode<synchronous>, transform_indices = @transform_4, window_bounds = array<i64: 1, 128>}, {transform_indices = @transform_5, window_bounds = array<i64: 8, 128>}]} {
    %c0 = arith.constant 0 : index
    %c0_0 = arith.constant 0 : index
    %0 = vector.load %arg1[%c0, %c0_0] : memref<8x128xbf16, #tpu.memory_space<vmem>>, vector<8x128xbf16>
    %c0_1 = arith.constant 0 : index
    %c0_2 = arith.constant 0 : index
    %1 = vector.load %arg2[%c0_1, %c0_2] : memref<128x1536xbf16, #tpu.memory_space<vmem>>, vector<128x1536xbf16>
    %cst = arith.constant dense<0.000000e+00> : vector<8x1536xf32>
    %2 = tpu.matmul %0, %1, %cst {dimension_numbers = #tpu.dot_dimension_numbers<[1], [0], [0], [1], [0, 0, 1, 1], [], []>} : vector<8x128xbf16>, vector<128x1536xbf16>, vector<8x1536xf32> -> vector<8x1536xf32>
    %3 = vector.extract_strided_slice %2 {offsets = [0, 0], sizes = [8, 384], strides = [1, 1]} : vector<8x1536xf32> to vector<8x384xf32>
    %4 = vector.extract_strided_slice %2 {offsets = [0, 384], sizes = [8, 384], strides = [1, 1]} : vector<8x1536xf32> to vector<8x384xf32>
    %5 = arith.maximumf %3, %4 : vector<8x384xf32>
    %6 = vector.extract_strided_slice %2 {offsets = [0, 768], sizes = [8, 384], strides = [1, 1]} : vector<8x1536xf32> to vector<8x384xf32>
    %7 = arith.maximumf %5, %6 : vector<8x384xf32>
    %8 = vector.extract_strided_slice %2 {offsets = [0, 1152], sizes = [8, 384], strides = [1, 1]} : vector<8x1536xf32> to vector<8x384xf32>
    %9 = arith.maximumf %7, %8 : vector<8x384xf32>
    %c0_3 = arith.constant 0 : index
    %c0_4 = arith.constant 0 : index
    %10 = vector.load %arg3[%c0_3, %c0_4] : memref<1x384xf32, #tpu.memory_space<vmem>>, vector<1x384xf32>
    %11 = vector.broadcast %10 : vector<1x384xf32> to vector<8x384xf32>
    %12 = arith.addf %9, %11 : vector<8x384xf32>
    %cst_5 = arith.constant 0.000000e+00 : f32
    %13 = vector.broadcast %cst_5 : f32 to vector<8x384xf32>
    %14 = arith.maximumf %12, %13 : vector<8x384xf32>
    %15 = arith.truncf %14 : vector<8x384xf32> to vector<8x384xbf16>
    %c0_6 = arith.constant 0 : index
    %c0_7 = arith.constant 0 : index
    %16 = vector.load %arg4[%c0_6, %c0_7] : memref<384x128xbf16, #tpu.memory_space<vmem>>, vector<384x128xbf16>
    %cst_8 = arith.constant dense<0.000000e+00> : vector<8x128xf32>
    %17 = tpu.matmul %15, %16, %cst_8 {dimension_numbers = #tpu.dot_dimension_numbers<[1], [0], [0], [1], [0, 0, 1, 1], [], []>} : vector<8x384xbf16>, vector<384x128xbf16>, vector<8x128xf32> -> vector<8x128xf32>
    %c32_i32 = arith.constant 32 : i32
    %18 = tpu.dynamic_rotate %17 by %c32_i32 dim 1 : vector<8x128xf32>, i32 -> vector<8x128xf32>
    %19 = arith.maximumf %17, %18 : vector<8x128xf32>
    %c64_i32 = arith.constant 64 : i32
    %20 = tpu.dynamic_rotate %19 by %c64_i32 dim 1 : vector<8x128xf32>, i32 -> vector<8x128xf32>
    %21 = arith.maximumf %19, %20 : vector<8x128xf32>
    %c0_9 = arith.constant 0 : index
    %c0_10 = arith.constant 0 : index
    %22 = vector.load %arg5[%c0_9, %c0_10] : memref<1x128xf32, #tpu.memory_space<vmem>>, vector<1x128xf32>
    %23 = vector.broadcast %22 : vector<1x128xf32> to vector<8x128xf32>
    %24 = arith.addf %21, %23 : vector<8x128xf32>
    %cst_11 = arith.constant 0.000000e+00 : f32
    %25 = vector.broadcast %cst_11 : f32 to vector<8x128xf32>
    %26 = arith.maximumf %24, %25 : vector<8x128xf32>
    %c0_12 = arith.constant 0 : index
    %c0_13 = arith.constant 0 : index
    %27 = vector.load %arg6[%c0_12, %c0_13] : memref<8x128xf32, #tpu.memory_space<vmem>>, vector<8x128xf32>
    tpu.vector_store %arg6[%c0_12, %c0_13], %26 {strides = array<i32>} : memref<8x128xf32, #tpu.memory_space<vmem>>, vector<8x128xf32>,
    return
  }
  func.func @transform_0(%arg0: i32) -> (i32, i32) {
    %c0_i32 = arith.constant 0 : i32
    %c0_i32_0 = arith.constant 0 : i32
    return %arg0, %c0_i32 : i32, i32
  }
  func.func @transform_1(%arg0: i32) -> (i32, i32) {
    %c0_i32 = arith.constant 0 : i32
    %c0_i32_0 = arith.constant 0 : i32
    %c0_i32_1 = arith.constant 0 : i32
    return %c0_i32, %c0_i32_0 : i32, i32
  }
  func.func @transform_2(%arg0: i32) -> (i32, i32) {
    %c0_i32 = arith.constant 0 : i32
    %c0_i32_0 = arith.constant 0 : i32
    %c0_i32_1 = arith.constant 0 : i32
    return %c0_i32, %c0_i32_0 : i32, i32
  }
  func.func @transform_3(%arg0: i32) -> (i32, i32) {
    %c0_i32 = arith.constant 0 : i32
    %c0_i32_0 = arith.constant 0 : i32
    %c0_i32_1 = arith.constant 0 : i32
    return %c0_i32, %c0_i32_0 : i32, i32
  }
  func.func @transform_4(%arg0: i32) -> (i32, i32) {
    %c0_i32 = arith.constant 0 : i32
    %c0_i32_0 = arith.constant 0 : i32
    %c0_i32_1 = arith.constant 0 : i32
    return %c0_i32, %c0_i32_0 : i32, i32
  }
  func.func @transform_5(%arg0: i32) -> (i32, i32) {
    %c0_i32 = arith.constant 0 : i32
    %c0_i32_0 = arith.constant 0 : i32
    return %arg0, %c0_i32 : i32, i32
  }
}

</mosaic_0001>

<bundles_post_ra>
// kernel: tile.13
= control target key start
LH: loop header
LB: loop body
LE: loop exit
PB: predicated region body
PF: predicated region fallthrough
CT: control target
= control target key end

     0   :  { %s28_s0 = inlined_call_operand.vmem [shape: f32[20], index: 0, kind: input, shape index: {}]   ;;  %s29_s1 = inlined_call_operand.vmem [shape: f32[16,20], index: 1, kind: output, shape index: {}]  }
   0x1   :  { %v4_v0 = vld [vmem:[%s28_s0] ss:$0 sm:$0xff] }
   0x2   :  { %5 = vst [vmem:[%s29_s1] sm:$0xff] %v4_v0  ;;  %8 = vst [vmem:[%s29_s1 + $0x8] sm:$0xff] %v4_v0 }

// kernel: tile.14
= control target key start
LH: loop header
LB: loop body
LE: loop exit
PB: predicated region body
PF: predicated region fallthrough
CT: control target
= control target key end

     0   :  { %vm9_vm0 = vcmask 64512   ;;  %vm22_vm1 = vcmask 130048   ;;  %s156_s14 = smov 120   ;;  %s157_s15 = smov 100   ;;  %vm3_vm2 = vcmask 162816   ;;  %vm13_vm3 = vcmask 97280   ;;  %s238_s0 = inlined_call_operand.vmem [shape: f32[16,20], index: 0, kind: input, shape index: {}]   ;;  %s239_s1 = inlined_call_operand.vmem [shape: f32[320], index: 1, kind: output, shape index: {}]  }
   0x1   :  { %v124_v0 = vld [vmem:[%s238_s0 + $0x6] sm:$0x1]   ;;  %v128_v3 = vld [vmem:[%s238_s0 + $0x5] sm:$0x1]   ;;  %v126_v4 = vld [vmem:[%s238_s0 + $0xc] sm:$0x1]  }
   0x2   :  { %v125_v1 = vld [vmem:[%s238_s0 + $0x6] sm:$0x1]   ;;  %34 = vrot.lane.b32.xlu1 %v128_v3, %s157_s15  ;;  %v127_v5 = vld [vmem:[%s238_s0 + $0xc] sm:$0x1]   ;;  %v129_v7 = vld [vmem:[%s238_s0 + $0xb] sm:$0x1]  }
   0x3   :  { %v10_v2 = vsel %vm9_vm0, %v125_v1, %v124_v0  ;;  %v23_v6 = vsel %vm22_vm1, %v127_v5, %v126_v4  ;;  %s158_s20 = smov 112   ;;  %s159_s21 = smov 92   ;;  %v130_v8 = vld [vmem:[%s238_s0 + $0x4] sm:$0x1]   ;;  %v131_v9 = vld [vmem:[%s238_s0 + $0xa] sm:$0x1]  }
   0x4   :  { %11 = vrot.lane.b32.xlu0 %v10_v2, %s156_s14  ;;  %v2_v10 = vld [vmem:[%s238_s0] sm:$0x1]   ;;  %s160_s28 = smov 80   ;;  %s161_s29 = smov 72   ;;  %v132_v11 = vld [vmem:[%s238_s0 + $0x3] sm:$0x1]  }
   0x5   :  { %4 = vst.msk [vmem:[#allocation0] sm:$0x1] %vm3_vm2, %v2_v10   ;;  %v133_v12 = vld [vmem:[%s238_s0 + $0x9] sm:$0x1]   ;;  %s162_s5 = smov 60   ;;  %s163_s6 = smov 52  }
   0x6   :  { %40 = vrot.lane.b32.xlu1 %v129_v7, %s159_s21  ;;  %v134_v13 = vld [vmem:[%s238_s0 + $0xf] sm:$0x1]   ;;  %v135_v14 = vld [vmem:[%s238_s0 + $0x2] sm:$0x1]   ;;  %s164_s11 = smov 44   ;;  %s165_s12 = smov 40  }
   0x7   :  { %v136_v15 = vld [vmem:[%s238_s0 + $0x8] sm:$0x1]   ;;  %v137_v16 = vld [vmem:[%s238_s0 + $0xe] sm:$0x1]   ;;  %s166_s17 = smov 32   ;;  %s167_s18 = smov 24  }
   0x8   :  { %24 = vrot.lane.b32.xlu0 %v23_v6, %s158_s20  ;;  %v138_v17 = vld [vmem:[%s238_s0 + $0x1] sm:$0x1]   ;;  %v139_v18 = vld [vmem:[%s238_s0 + $0x7] sm:$0x1]   ;;  %s168_s23 = smov 20   ;;  %s169_s24 = smov 12  }
   0x9   :  { %v140_v19 = vld [vmem:[%s238_s0 + $0xd] sm:$0x1]   ;;  %s170_s0 = smov 4   ;;  %vm16_vm4 = vcmask 1048512   ;;  %vm36_vm5 = vcmask 982816   ;;  %vm26_vm6 = vcmask 31744  }
   0xa   :  { %53 = vrot.lane.b32.xlu1 %v131_v9, %s161_s29  ;;  %vm29_vm7 = vcmask 1048448   ;;  %vm42_vm8 = vcmask 917216   ;;  %vm49_vm9 = vcmask 818816   ;;  %vm55_vm10 = vcmask 753216  }
   0xb   :  { %vm62_vm11 = vcmask 654816   ;;  %vm68_vm12 = vcmask 589216   ;;  %vm75_vm13 = vcmask 523616   ;;  %vm82_vm14 = vcmask 490816  }
   0xc   :  { %47 = vrot.lane.b32.xlu0 %v130_v8, %s160_s28  ;;  %vm88_vm15 = vcmask 425216   ;;  %vm95_vm0 = vcmask 359616   ;;  %vm102_vm1 = vcmask 326816   ;;  %vm108_vm2 = vcmask 261216  }
   0xe   :  { %66 = vrot.lane.b32.xlu1 %v133_v12, %s163_s6 }
  0x10   :  { %60 = vrot.lane.b32.xlu0 %v132_v11, %s162_s5 }
  0x12   :  { %80 = vrot.lane.b32.xlu1 %v135_v14, %s165_s12 }
  0x14   :  { %73 = vrot.lane.b32.xlu0 %v134_v13, %s164_s11 }
  0x16   :  { %93 = vrot.lane.b32.xlu1 %v137_v16, %s167_s18 }
  0x18   :  { %86 = vrot.lane.b32.xlu0 %v136_v15, %s166_s17 }
  0x1a   :  { %106 = vrot.lane.b32.xlu1 %v139_v18, %s169_s24 }
  0x1c   :  { %100 = vrot.lane.b32.xlu0 %v138_v17, %s168_s23 }
  0x20   :  { %113 = vrot.lane.b32.xlu0 %v140_v19, %s170_s0 }
  0x74   :  { %v35_v21 = vpop.permute.xlu1 %34  }
  0x76   :  { %v12_v20 = vpop.permute.xlu0 %11  }
  0x77   :  { %15 = vst.msk [vmem:[#allocation0 + $0x1] sm:$0x1] %vm13_vm3, %v12_v20   ;;  %vm115_vm3 = vcmask 195616  }
  0x78   :  { %17 = vst.msk [vmem:[#allocation0] sm:$0x1] %vm16_vm4, %v12_v20   ;;  %v41_v23 = vpop.permute.xlu1 %40  }
  0x79   :  { %37 = vst.msk [vmem:[#allocation0] sm:$0x1] %vm36_vm5, %v35_v21  }
  0x7a   :  { %v25_v22 = vpop.permute.xlu0 %24  }
  0x7b   :  { %28 = vst.msk [vmem:[#allocation0 + $0x2] sm:$0x1] %vm26_vm6, %v25_v22  }
  0x7c   :  { %31 = vst.msk [vmem:[#allocation0 + $0x1] sm:$0x1] %vm29_vm7, %v25_v22   ;;  %v54_v25 = vpop.permute.xlu1 %53  }
  0x7d   :  { %44 = vst.msk [vmem:[#allocation0 + $0x1] sm:$0x1] %vm42_vm8, %v41_v23  }
  0x7e   :  { %v48_v24 = vpop.permute.xlu0 %47   ;;  %57 = vst.msk [vmem:[#allocation0 + $0x1] sm:$0x1] %vm55_vm10, %v54_v25  }
  0x7f   :  { %50 = vst.msk [vmem:[#allocation0] sm:$0x1] %vm49_vm9, %v48_v24  }
  0x80   :  { %v67_v27 = vpop.permute.xlu1 %66  }
  0x81   :  { %70 = vst.msk [vmem:[#allocation0 + $0x1] sm:$0x1] %vm68_vm12, %v67_v27  }
  0x82   :  { %v61_v26 = vpop.permute.xlu0 %60  }
  0x83   :  { %63 = vst.msk [vmem:[#allocation0] sm:$0x1] %vm62_vm11, %v61_v26  }
  0x84   :  { %v81_v29 = vpop.permute.xlu1 %80  }
  0x85   :  { %83 = vst.msk [vmem:[#allocation0] sm:$0x1] %vm82_vm14, %v81_v29  }
  0x86   :  { %v74_v28 = vpop.permute.xlu0 %73  }
  0x87   :  { %77 = vst.msk [vmem:[#allocation0 + $0x2] sm:$0x1] %vm75_vm13, %v74_v28  }
  0x88   :  { %v94_v31 = vpop.permute.xlu1 %93  }
  0x89   :  { %97 = vst.msk [vmem:[#allocation0 + $0x2] sm:$0x1] %vm95_vm0, %v94_v31  }
  0x8a   :  { %v87_v30 = vpop.permute.xlu0 %86  }
  0x8b   :  { %90 = vst.msk [vmem:[#allocation0 + $0x1] sm:$0x1] %vm88_vm15, %v87_v30  }
  0x8c   :  { %v107_v33 = vpop.permute.xlu1 %106  }
  0x8d   :  { %110 = vst.msk [vmem:[#allocation0 + $0x1] sm:$0x1] %vm108_vm2, %v107_v33  }
  0x8e   :  { %v101_v32 = vpop.permute.xlu0 %100  }
  0x8f   :  { %103 = vst.msk [vmem:[#allocation0] sm:$0x1] %vm102_vm1, %v101_v32  }
  0x92   :  { %v114_v34 = vpop.permute.xlu0 %113  }
  0x93   :  { %117 = vst.msk [vmem:[#allocation0 + $0x2] sm:$0x1] %vm115_vm3, %v114_v34  }
  0x9a   :  { %v121_v35 = vld [vmem:[#allocation0] sm:$0xf] }
  0x9b   :  { %123 = vst [vmem:[%s239_s1] sm:$0xf] %v121_v35 }

// kernel: tile.18
= control target key start
LH: loop header
LB: loop body
LE: loop exit
PB: predicated region body
PF: predicated region fallthrough
CT: control target
= control target key end

     0   :  { %s22_s0 = inlined_call_operand.vmem [shape: f32[32], index: 0, kind: input, shape index: {}]   ;;  %s23_s1 = inlined_call_operand.vmem [shape: f32[4,32], index: 1, kind: output, shape index: {}]  }
   0x1   :  { %v4_v0 = vld [vmem:[%s22_s0] ss:$0 sm:$0xff] }
   0x2   :  { %5 = vst [vmem:[%s23_s1] sm:$0xf] %v4_v0 }

// kernel: tile.19
= control target key start
LH: loop header
LB: loop body
LE: loop exit
PB: predicated region body
PF: predicated region fallthrough
CT: control target
= control target key end

     0   :  { %vm7_vm0 = vcmask 261120   ;;  %s37_s8 = smov 32   ;;  %s38_s9 = smov 64   ;;  %vm13_vm1 = vcmask 1048320   ;;  %vm19_vm2 = vcmask 785920   ;;  %vm25_vm3 = vcmask 523520   ;;  %s55_s0 = inlined_call_operand.vmem [shape: f32[4,32], index: 0, kind: input, shape index: {}]   ;;  %s56_s1 = inlined_call_operand.vmem [shape: f32[1,128], index: 1, kind: output, shape index: {}]  }
   0x1   :  { %v4_v0 = vld [vmem:[%s55_s0] sm:$0xf]  ;;  %s36_s0 = smov 96  }
   0x2   :  { %5 = vst [vmem:[#allocation1] sm:$0xf] %v4_v0 }
   0x9   :  { %v10_v1 = vld [vmem:[#allocation1 + $0x3] sm:$0x1]   ;;  %v22_v2 = vld [vmem:[#allocation1 + $0x1] sm:$0x1]   ;;  %v6_v3 = vld [vmem:[#allocation1] sm:$0x1]  }
   0xa   :  { %11 = vrot.lane.b32.xlu0 %v10_v1, %s36_s0  ;;  %23 = vrot.lane.b32.xlu1 %v22_v2, %s37_s8  ;;  %v16_v4 = vld [vmem:[#allocation1 + $0x2] sm:$0x1]   ;;  %8 = vst.msk [vmem:[#allocation0] sm:$0x1] %vm7_vm0, %v6_v3  }
   0xe   :  { %17 = vrot.lane.b32.xlu0 %v16_v4, %s38_s9 }
  0x7c   :  { %v12_v5 = vpop.permute.xlu0 %11   ;;  %v24_v6 = vpop.permute.xlu1 %23  }
  0x7d   :  { %14 = vst.msk [vmem:[#allocation0] sm:$0x1] %vm13_vm1, %v12_v5  }
  0x80   :  { %v18_v7 = vpop.permute.xlu0 %17  }
  0x81   :  { %20 = vst.msk [vmem:[#allocation0] sm:$0x1] %vm19_vm2, %v18_v7  }
  0x82   :  { %26 = vst.msk [vmem:[#allocation0] sm:$0x1] %vm25_vm3, %v24_v6  }
  0x89   :  { %v30_v8 = vld [vmem:[#allocation0] sm:$0x1] }
  0x8a   :  { %32 = vst [vmem:[%s56_s1] sm:$0x1] %v30_v8 }

// kernel: convolution_forward.1
= control target key start
LH: loop header
LB: loop body
LE: loop exit
PB: predicated region body
PF: predicated region fallthrough
CT: control target
= control target key end

     0   :  { %10 = vsyncpa [#allocation3], 0  ;;  %s2414_s0 = inlined_call_operand.vmem [shape: bf16[16,128], index: 0, kind: input, shape index: {}]   ;;  %s2415_s1 = inlined_call_operand.vmem [shape: bf16[128,1536], index: 1, kind: input, shape index: {}]   ;;  %s2416_s2 = inlined_call_operand.vmem [shape: f32[1,384], index: 2, kind: input, shape index: {}]   ;;  %s2417_s3 = inlined_call_operand.vmem [shape: bf16[384,128], index: 3, kind: input, shape index: {}]   ;;  %s2418_s4 = inlined_call_operand.vmem [shape: f32[1,128], index: 4, kind: input, shape index: {}]   ;;  %s2419_s5 = inlined_call_operand.hbm [shape: f32[16,128], index: 5, kind: output, shape index: {}]  }
   0x1   :  { %12 = vsyncpa [#allocation3 + $0x1], 0  ;;  %s1934_s18 = smov 0   ;;  %s1936_s19 = smov 0  }
   0x2   :  { %s1938_s20 = smov 0   ;;  %s1940_s21 = smov 0  }
   0x3 LB: > { %s1955_s22 = sadd.s32 4294967295, %s1896_s21   ;;  %s1440_s23 = sadd.s32 4294967294, %s1896_s21   ;;  %s1896_s21 = sphi %s1940_s21, %s2425_s21   ;;  %s1892_s20 = sphi %s1938_s20, %s2424_s20   ;;  %s1888_s19 = sphi %s1936_s19, %s2423_s19   ;;  %s1884_s18 = sphi %s1934_s18, %s2422_s18  }
   0x4   : > { %s1959_s24 = sadd.s32 1, %s1896_s21   ;;  %s135_s25 = sadd.s32 1, %s1892_s20 }
   0x5   : > { %s132_s26 = ssub.s32 %s1896_s21, %s1959_s24  ;;  %p145_p0 = scmp.ne.s32.totalorder %s1892_s20, %s1888_s19 }
   0x6   : > { %p133_p1 = scmp.eq.s32.totalorder %s132_s26, 0  ;;  %p146_p2 = scmp.eq.s32.totalorder %s1955_s22, 1 }
   0x7   : > { %p151_p3 = scmp.ne.s32.totalorder %s1888_s19, %s1884_s18  ;;  %p152_p4 = scmp.eq.s32.totalorder %s1440_s23, 1 }
   0x8   : > { %s1970_s27 = scalar_select %p133_p1, %s1892_s20, %s135_s25  }
   0x9   : > { %p1972_p5 = por %p146_p2, %p145_p0  ;;  %p1976_p6 = por %p152_p4, %p151_p3 }
   0xa   : > { %p1443_p7 = scmp.ge.s32.totalorder %s1896_s21, 1  ;;  %p189_p8 = scmp.lt.s32.totalorder %s1896_s21, 3 }
   0xc   : > { %p190_p9 = pnand %p1443_p7, %p189_p8 }
   0xd   : > { %v1666_v0 = vld [vmem:[%s2415_s1 + $0x4] ss:$48 sps:$4 sm:$0xff] (!%p190_p9)   ;;  %v1668_v1 = vld [vmem:[%s2415_s1 + $0xc] ss:$48 sps:$4 sm:$0xff] (!%p190_p9)   ;;  %v1898_v2 = vmov (!%p190_p9), 0   ;;  %p216_p10 = scmp.lt.s32.totalorder (!%p190_p9), %s1955_s22, 1 }
   0xe   : > { %193 = sbr.rel (%p190_p9) target bundleno = 801 (0x321), region = 40  ;;  %830 = vmatprep.mubr.bf16.mxu0 (!%p190_p9), %v1898_v2  ;;  %871 = vmatprep.mubr.bf16.mxu1 (!%p190_p9), %v1898_v2  ;;  %v1670_v3 = vld [vmem:[%s2415_s1] ss:$48 sps:$4 sm:$0xff] (!%p190_p9)   ;;  %v1671_v4 = vld [vmem:[%s2415_s1 + $0x8] ss:$48 sps:$4 sm:$0xff] (!%p190_p9)   ;;  %vm1900_vm0 = vmmov (!%p190_p9), 0  }
   0xf   : > { %798 = vmatprep.subr.bf16.mxu0 (!%p190_p9), %v1666_v0  ;;  %839 = vmatprep.subr.bf16.mxu1 (!%p190_p9), %v1668_v1  ;;  %v1672_v5 = vld [vmem:[%s2415_s1 + $0x64] ss:$48 sps:$4 sm:$0xff] (!%p190_p9)   ;;  %v1674_v6 = vld [vmem:[%s2415_s1 + $0x6c] ss:$48 sps:$4 sm:$0xff] (!%p190_p9)   ;;  %v1676_v7 = vld [vmem:[%s2415_s1 + $0x60] ss:$48 sps:$4 sm:$0xff] (!%p190_p9)  }
  0x10   : > { %799 = vmatpush1.bf16.msra.mxu0 (!%p190_p9), %v1670_v3  ;;  %840 = vmatpush1.bf16.msra.mxu1 (!%p190_p9), %v1671_v4  ;;  %v1677_v8 = vld [vmem:[%s2415_s1 + $0x68] ss:$48 sps:$4 sm:$0xff] (!%p190_p9)   ;;  %v1678_v9 = vld [vmem:[%s2415_s1 + $0xc4] ss:$48 sps:$4 sm:$0xff] (!%p190_p9)   ;;  %v1680_v10 = vld [vmem:[%s2415_s1 + $0xcc] ss:$48 sps:$4 sm:$0xff] (!%p190_p9)  }
  0x11   : > { %800 = vmatprep.subr.bf16.mxu0 (!%p190_p9), %v1672_v5  ;;  %841 = vmatprep.subr.bf16.mxu1 (!%p190_p9), %v1674_v6  ;;  %v1682_v11 = vld [vmem:[%s2415_s1 + $0xc0] ss:$48 sps:$4 sm:$0xff] (!%p190_p9)   ;;  %v1683_v12 = vld [vmem:[%s2415_s1 + $0xc8] ss:$48 sps:$4 sm:$0xff] (!%p190_p9)   ;;  %v1684_v13 = vld [vmem:[%s2415_s1 + $0x124] ss:$48 sps:$4 sm:$0xff] (!%p190_p9)  }
  0x12   : > { %v1686_v14 = vld [vmem:[%s2415_s1 + $0x12c] ss:$48 sps:$4 sm:$0xff] (!%p190_p9)   ;;  %v1688_v15 = vld [vmem:[%s2415_s1 + $0x120] ss:$48 sps:$4 sm:$0xff] (!%p190_p9)   ;;  %v1689_v16 = vld [vmem:[%s2415_s1 + $0x128] ss:$48 sps:$4 sm:$0xff] (!%p190_p9)  }
  0x13   : > { %v1690_v17 = vld [vmem:[%s2415_s1 + $0x184] ss:$48 sps:$4 sm:$0xff] (!%p190_p9)   ;;  %v1692_v18 = vld [vmem:[%s2415_s1 + $0x18c] ss:$48 sps:$4 sm:$0xff] (!%p190_p9)   ;;  %v1694_v19 = vld [vmem:[%s2415_s1 + $0x180] ss:$48 sps:$4 sm:$0xff] (!%p190_p9)  }
  0x14   : > { %801 = vmatpush1.bf16.msra.mxu0 (!%p190_p9), %v1676_v7  ;;  %842 = vmatpush1.bf16.msra.mxu1 (!%p190_p9), %v1677_v8  ;;  %v1695_v20 = vld [vmem:[%s2415_s1 + $0x188] ss:$48 sps:$4 sm:$0xff] (!%p190_p9)   ;;  %v1696_v21 = vld [vmem:[%s2415_s1 + $0x1e4] ss:$48 sps:$4 sm:$0xff] (!%p190_p9)   ;;  %v1698_v22 = vld [vmem:[%s2415_s1 + $0x1ec] ss:$48 sps:$4 sm:$0xff] (!%p190_p9)  }
  0x15   : > { %802 = vmatprep.subr.bf16.mxu0 %v1678_v9  ;;  %843 = vmatprep.subr.bf16.mxu1 %v1680_v10  ;;  %v1700_v23 = vld [vmem:[%s2415_s1 + $0x1e0] ss:$48 sps:$4 sm:$0xff]   ;;  %v1701_v24 = vld [vmem:[%s2415_s1 + $0x1e8] ss:$48 sps:$4 sm:$0xff]   ;;  %s217_s30 = scalar_select %p216_p10, %s1955_s22, 1 }
  0x16   : > { %v1702_v25 = vld [vmem:[%s2415_s1 + $0x244] ss:$48 sps:$4 sm:$0xff]   ;;  %v1704_v26 = vld [vmem:[%s2415_s1 + $0x24c] ss:$48 sps:$4 sm:$0xff]   ;;  %v1706_v27 = vld [vmem:[%s2415_s1 + $0x240] ss:$48 sps:$4 sm:$0xff]  }
  0x17   : > { %v1707_v28 = vld [vmem:[%s2415_s1 + $0x248] ss:$48 sps:$4 sm:$0xff]   ;;  %s1445_s14 = sshll.u32 %s217_s30, 2  ;;  %v1708_v29 = vld [vmem:[%s2415_s1 + $0x2a4] ss:$48 sps:$4 sm:$0xff]   ;;  %s1901_s12 = smov 32  }
  0x18   : > { %803 = vmatpush1.bf16.msra.mxu0 %v1682_v11  ;;  %844 = vmatpush1.bf16.msra.mxu1 %v1683_v12  ;;  %v1710_v30 = vld [vmem:[%s2415_s1 + $0x2ac] ss:$48 sps:$4 sm:$0xff]   ;;  %v1712_v31 = vld [vmem:[%s2415_s1 + $0x2a0] ss:$48 sps:$4 sm:$0xff]   ;;  %s219_s8 = scalar_lea.vmem %s2414_s0, %s1445_s14  ;;  %v1713_v32 = vld [vmem:[%s2415_s1 + $0x2a8] ss:$48 sps:$4 sm:$0xff]  }
  0x19   : > { %804 = vmatprep.subr.bf16.mxu0 %v1684_v13  ;;  %845 = vmatprep.subr.bf16.mxu1 %v1686_v14  ;;  %v1716_v33 = vld [vmem:[%s2415_s1 + $0x14] ss:$48 sps:$4 sm:$0xff]   ;;  %v1719_v34 = vld [vmem:[%s2415_s1 + $0x1c] ss:$48 sps:$4 sm:$0xff]   ;;  %v2091_v35 = vld [vmem:[%s219_s8] sm:$0xf] }
  0x1a   : > { %v1714_v36 = vld [vmem:[%s2415_s1 + $0x10] ss:$48 sps:$4 sm:$0xff]   ;;  %v1717_v37 = vld [vmem:[%s2415_s1 + $0x18] ss:$48 sps:$4 sm:$0xff]   ;;  %v1722_v38 = vld [vmem:[%s2415_s1 + $0x74] ss:$48 sps:$4 sm:$0xff]  }
  0x1b   : > { %v1725_v39 = vld [vmem:[%s2415_s1 + $0x7c] ss:$48 sps:$4 sm:$0xff]   ;;  %v1720_v40 = vld [vmem:[%s2415_s1 + $0x70] ss:$48 sps:$4 sm:$0xff]   ;;  %v1723_v41 = vld [vmem:[%s2415_s1 + $0x78] ss:$48 sps:$4 sm:$0xff]  }
  0x1c   : > { %805 = vmatpush1.bf16.msra.mxu0 %v1688_v15  ;;  %846 = vmatpush1.bf16.msra.mxu1 %v1689_v16  ;;  %v1728_v42 = vld [vmem:[%s2415_s1 + $0xd4] ss:$48 sps:$4 sm:$0xff]   ;;  %v1731_v43 = vld [vmem:[%s2415_s1 + $0xdc] ss:$48 sps:$4 sm:$0xff]   ;;  %v1726_v44 = vld [vmem:[%s2415_s1 + $0xd0] ss:$48 sps:$4 sm:$0xff]  }
  0x1d   : > { %806 = vmatprep.subr.bf16.mxu0 %v1690_v17  ;;  %847 = vmatprep.subr.bf16.mxu1 %v1692_v18  ;;  %v1729_v45 = vld [vmem:[%s2415_s1 + $0xd8] ss:$48 sps:$4 sm:$0xff]   ;;  %v1734_v46 = vld [vmem:[%s2415_s1 + $0x134] ss:$48 sps:$4 sm:$0xff]   ;;  %v1737_v47 = vld [vmem:[%s2415_s1 + $0x13c] ss:$48 sps:$4 sm:$0xff]  }
  0x1e   : > { %v1732_v48 = vld [vmem:[%s2415_s1 + $0x130] ss:$48 sps:$4 sm:$0xff]   ;;  %v1735_v49 = vld [vmem:[%s2415_s1 + $0x138] ss:$48 sps:$4 sm:$0xff]   ;;  %v1740_v50 = vld [vmem:[%s2415_s1 + $0x194] ss:$48 sps:$4 sm:$0xff]  }
  0x1f   : > { %v1743_v51 = vld [vmem:[%s2415_s1 + $0x19c] ss:$48 sps:$4 sm:$0xff]   ;;  %v1738_v52 = vld [vmem:[%s2415_s1 + $0x190] ss:$48 sps:$4 sm:$0xff]   ;;  %v1741_v53 = vld [vmem:[%s2415_s1 + $0x198] ss:$48 sps:$4 sm:$0xff]  }
  0x20   : > { %807 = vmatpush1.bf16.msra.mxu0 %v1694_v19  ;;  %848 = vmatpush1.bf16.msra.mxu1 %v1695_v20  ;;  %v1746_v54 = vld [vmem:[%s2415_s1 + $0x1f4] ss:$48 sps:$4 sm:$0xff]   ;;  %v1749_v55 = vld [vmem:[%s2415_s1 + $0x1fc] ss:$48 sps:$4 sm:$0xff]   ;;  %v1744_v56 = vld [vmem:[%s2415_s1 + $0x1f0] ss:$48 sps:$4 sm:$0xff]  }
  0x21   : > { %808 = vmatprep.subr.bf16.mxu0 %v1696_v21  ;;  %849 = vmatprep.subr.bf16.mxu1 %v1698_v22  ;;  %v1747_v57 = vld [vmem:[%s2415_s1 + $0x1f8] ss:$48 sps:$4 sm:$0xff]   ;;  %v1752_v58 = vld [vmem:[%s2415_s1 + $0x254] ss:$48 sps:$4 sm:$0xff]   ;;  %v1755_v59 = vld [vmem:[%s2415_s1 + $0x25c] ss:$48 sps:$4 sm:$0xff]  }
  0x22   : > { %v1750_v60 = vld [vmem:[%s2415_s1 + $0x250] ss:$48 sps:$4 sm:$0xff]   ;;  %v1753_v61 = vld [vmem:[%s2415_s1 + $0x258] ss:$48 sps:$4 sm:$0xff]   ;;  %v1758_v62 = vld [vmem:[%s2415_s1 + $0x2b4] ss:$48 sps:$4 sm:$0xff]  }
  0x23   : > { %v1761_v63 = vld [vmem:[%s2415_s1 + $0x2bc] ss:$48 sps:$4 sm:$0xff]   ;;  %v1756_v0 = vld [vmem:[%s2415_s1 + $0x2b0] ss:$48 sps:$4 sm:$0xff]   ;;  %v1759_v1 = vld [vmem:[%s2415_s1 + $0x2b8] ss:$48 sps:$4 sm:$0xff]  }
  0x24   : > { %809 = vmatpush1.bf16.msra.mxu0 %v1700_v23  ;;  %850 = vmatpush1.bf16.msra.mxu1 %v1701_v24  ;;  %v1764_v3 = vld [vmem:[%s2415_s1 + $0x24] ss:$48 sps:$4 sm:$0xff]   ;;  %v1767_v4 = vld [vmem:[%s2415_s1 + $0x2c] ss:$48 sps:$4 sm:$0xff]   ;;  %v1762_v5 = vld [vmem:[%s2415_s1 + $0x20] ss:$48 sps:$4 sm:$0xff]  }
  0x25   : > { %810 = vmatprep.subr.bf16.mxu0 %v1702_v25  ;;  %851 = vmatprep.subr.bf16.mxu1 %v1704_v26  ;;  %v1765_v6 = vld [vmem:[%s2415_s1 + $0x28] ss:$48 sps:$4 sm:$0xff]   ;;  %v1770_v7 = vld [vmem:[%s2415_s1 + $0x84] ss:$48 sps:$4 sm:$0xff]   ;;  %v1773_v8 = vld [vmem:[%s2415_s1 + $0x8c] ss:$48 sps:$4 sm:$0xff]  }
  0x26   : > { %v1768_v9 = vld [vmem:[%s2415_s1 + $0x80] ss:$48 sps:$4 sm:$0xff]   ;;  %v1771_v10 = vld [vmem:[%s2415_s1 + $0x88] ss:$48 sps:$4 sm:$0xff]   ;;  %v1776_v11 = vld [vmem:[%s2415_s1 + $0xe4] ss:$48 sps:$4 sm:$0xff]  }
  0x27   : > { %v1779_v12 = vld [vmem:[%s2415_s1 + $0xec] ss:$48 sps:$4 sm:$0xff]   ;;  %v1774_v13 = vld [vmem:[%s2415_s1 + $0xe0] ss:$48 sps:$4 sm:$0xff]   ;;  %v1777_v14 = vld [vmem:[%s2415_s1 + $0xe8] ss:$48 sps:$4 sm:$0xff]  }
  0x28   : > { %811 = vmatpush1.bf16.msra.mxu0 %v1706_v27  ;;  %852 = vmatpush1.bf16.msra.mxu1 %v1707_v28  ;;  %v1782_v15 = vld [vmem:[%s2415_s1 + $0x144] ss:$48 sps:$4 sm:$0xff]   ;;  %v1785_v16 = vld [vmem:[%s2415_s1 + $0x14c] ss:$48 sps:$4 sm:$0xff]   ;;  %v1780_v17 = vld [vmem:[%s2415_s1 + $0x140] ss:$48 sps:$4 sm:$0xff]  }
  0x29   : > { %812 = vmatprep.subr.bf16.mxu0 %v1708_v29  ;;  %853 = vmatprep.subr.bf16.mxu1 %v1710_v30  ;;  %v1788_v18 = vld [vmem:[%s2415_s1 + $0x1a4] ss:$48 sps:$4 sm:$0xff]   ;;  %v1791_v19 = vld [vmem:[%s2415_s1 + $0x1ac] ss:$48 sps:$4 sm:$0xff]   ;;  %v1786_v20 = vld [vmem:[%s2415_s1 + $0x1a0] ss:$48 sps:$4 sm:$0xff]  }
  0x2a   : > { %v1789_v21 = vld [vmem:[%s2415_s1 + $0x1a8] ss:$48 sps:$4 sm:$0xff]   ;;  %v1794_v22 = vld [vmem:[%s2415_s1 + $0x204] ss:$48 sps:$4 sm:$0xff]   ;;  %v1797_v23 = vld [vmem:[%s2415_s1 + $0x20c] ss:$48 sps:$4 sm:$0xff]  }
  0x2b   : > { %v1792_v24 = vld [vmem:[%s2415_s1 + $0x200] ss:$48 sps:$4 sm:$0xff]   ;;  %v1795_v25 = vld [vmem:[%s2415_s1 + $0x208] ss:$48 sps:$4 sm:$0xff]   ;;  %v1800_v26 = vld [vmem:[%s2415_s1 + $0x264] ss:$48 sps:$4 sm:$0xff]  }
  0x2c   : > { %813 = vmatpush1.bf16.msra.mxu0 %v1712_v31  ;;  %854 = vmatpush1.bf16.msra.mxu1 %v1713_v32  ;;  %v1803_v27 = vld [vmem:[%s2415_s1 + $0x26c] ss:$48 sps:$4 sm:$0xff]   ;;  %v1798_v28 = vld [vmem:[%s2415_s1 + $0x260] ss:$48 sps:$4 sm:$0xff]   ;;  %v1801_v29 = vld [vmem:[%s2415_s1 + $0x268] ss:$48 sps:$4 sm:$0xff]  }
  0x2d   : > { %880 = vmatprep.subr.bf16.mxu0 %v1716_v33  ;;  %921 = vmatprep.subr.bf16.mxu1 %v1719_v34  ;;  %v1806_v30 = vld [vmem:[%s2415_s1 + $0x2c4] ss:$48 sps:$4 sm:$0xff]   ;;  %v1809_v31 = vld [vmem:[%s2415_s1 + $0x2cc] ss:$48 sps:$4 sm:$0xff]   ;;  %v1804_v32 = vld [vmem:[%s2415_s1 + $0x2c0] ss:$48 sps:$4 sm:$0xff]  }
  0x2e   : > { %v1807_v33 = vld [vmem:[%s2415_s1 + $0x2c8] ss:$48 sps:$4 sm:$0xff]   ;;  %v1810_v34 = vld [vmem:[%s2417_s3 + $0x40] sm:$0xff]   ;;  %s1902_s13 = smov 64   ;;  %s213_s15 = sand.u32 1, %s1888_s19  }
  0x2f   : > { %831 = vmatmul.mubr.bf16.vlgmr.msra.gmra.mrb[0].mxu0 %v2091_v35  ;;  %872 = vmatmul.mubr.bf16.vlgmr.msra.gmra.mrb[0].mxu1 %v2091_v35  ;;  %s1444_s14 = sshll.u32 %s213_s15, 3  ;;  %s1568_s23 = sshll.u32 %s1955_s22, 7 }
  0x30   : > { %881 = vmatpush1.bf16.msra.mxu0 %v1714_v36  ;;  %922 = vmatpush1.bf16.msra.mxu1 %v1717_v37  ;;  %v1811_v36 = vld [vmem:[%s2417_s3] sm:$0xff]   ;;  %s215_s25 = scalar_lea.vmem [#allocation2], %s1444_s14  ;;  %s2372_s8 = scalar_lea.hbm %s2419_s5, %s1568_s23 }
  0x31   : > { %882 = vmatprep.subr.bf16.mxu0 %v1722_v38  ;;  %923 = vmatprep.subr.bf16.mxu1 %v1725_v39  ;;  %v1812_v37 = vld [vmem:[%s2417_s3 + $0x80] sm:$0xff]   ;;  %v1899_v38 = vmov 0.0   ;;  %v1813_v39 = vld [vmem:[%s2417_s3 + $0x48] sm:$0xff]   ;;  %s1381_s26 = sshll.u32 %s215_s25, 4  ;;  %s1368_s30 = scalar_lea.sflag [#allocation3], %s213_s15  ;;  %s2374_s26 = int_to_ptr.vmem [resolvable:$true] %s1381_s26 }
  0x32   : > { %912 = vmatprep.mubr.bf16.mxu0 %v1898_v2  ;;  %953 = vmatprep.mubr.bf16.mxu1 %v1898_v2  ;;  %s1834_s9 = scalar_lea.vmem %s2374_s26, 128  ;;  %s1903_s22 = smov [#allocation2]  }
  0x33   : > { %p1835_p11 = scmp.ne.s32.totalorder %s2374_s26, %s1834_s9  ;;  %s1838_s10 = sshll.u32 %s1903_s22, 4  ;;  %s1839_s10 = int_to_ptr.vmem [resolvable:$false] %s1838_s10 }
  0x34   : > { %883 = vmatpush1.bf16.msra.mxu0 %v1720_v40  ;;  %924 = vmatpush1.bf16.msra.mxu1 %v1723_v41  ;;  %v1814_v40 = vld [vmem:[%s2417_s3 + $0x8] sm:$0xff]   ;;  %v1816_v41 = vld [vmem:[%s2417_s3 + $0x50] sm:$0xff]   ;;  %s1840_s11 = scalar_lea.vmem %s1839_s10, 256  ;;  %p1841_p0 = scmp.lt.s32.totalorder %s2374_s26, %s1839_s10 }
  0x35   : > { %884 = vmatprep.subr.bf16.mxu0 %v1728_v42  ;;  %925 = vmatprep.subr.bf16.mxu1 %v1731_v43  ;;  %v1818_v42 = vld [vmem:[%s2417_s3 + $0x90] sm:$0xff]   ;;  %p1836_p12 = pnand %p1835_p11, %p1972_p5  ;;  %p1842_p1 = scmp.lt.s32.totalorder %s1840_s11, %s1834_s9 }
  0x36   : > { %v1817_v43 = vld [vmem:[%s2417_s3 + $0x10] sm:$0xff]  }
  0x37   : > { %p1837_p13 = pneg %p1836_p12  ;;  %p1843_p2 = por %p1842_p1, %p1841_p0 }
  0x38   : > { %885 = vmatpush1.bf16.msra.mxu0 %v1726_v44  ;;  %926 = vmatpush1.bf16.msra.mxu1 %v1729_v45  ;;  %v1819_v44 = vld [vmem:[%s2417_s3 + $0x58] sm:$0xff]  }
  0x39   : > { %886 = vmatprep.subr.bf16.mxu0 %v1734_v46  ;;  %927 = vmatprep.subr.bf16.mxu1 %v1737_v47  ;;  %v1821_v45 = vld [vmem:[%s2417_s3 + $0x98] sm:$0xff]   ;;  %v1822_v47 = vld [vmem:[%s2417_s3 + $0x60] sm:$0xff]   ;;  %p1844_p3 = pnand %p1843_p2, %p1837_p13 }
  0x3a   : > { %v1820_v46 = vld [vmem:[%s2417_s3 + $0x18] sm:$0xff]  }
  0x3c   : > { %887 = vmatpush1.bf16.msra.mxu0 %v1732_v48  ;;  %928 = vmatpush1.bf16.msra.mxu1 %v1735_v49  ;;  %v1824_v48 = vld [vmem:[%s2417_s3 + $0xa0] sm:$0xff]  }
  0x3d   : > { %888 = vmatprep.subr.bf16.mxu0 %v1740_v50  ;;  %929 = vmatprep.subr.bf16.mxu1 %v1743_v51  ;;  %v1823_v49 = vld [vmem:[%s2417_s3 + $0x20] sm:$0xff]   ;;  %v1825_v50 = vld [vmem:[%s2417_s3 + $0x68] sm:$0xff]  }
  0x3e   : > { %v1826_v51 = vld [vmem:[%s2417_s3 + $0x28] sm:$0xff]  }
  0x40   : > { %889 = vmatpush1.bf16.msra.mxu0 %v1738_v52  ;;  %930 = vmatpush1.bf16.msra.mxu1 %v1741_v53  ;;  %v1827_v52 = vld [vmem:[%s2417_s3 + $0xa8] sm:$0xff]   ;;  %v1828_v53 = vld [vmem:[%s2417_s3 + $0x70] sm:$0xff]  }
  0x41   : > { %890 = vmatprep.subr.bf16.mxu0 %v1746_v54  ;;  %931 = vmatprep.subr.bf16.mxu1 %v1749_v55  ;;  %v1829_v54 = vld [vmem:[%s2417_s3 + $0x30] sm:$0xff]  }
  0x42   : > { %v1830_v55 = vld [vmem:[%s2417_s3 + $0xb0] sm:$0xff]  }
  0x44   : > { %891 = vmatpush1.bf16.msra.mxu0 %v1744_v56  ;;  %932 = vmatpush1.bf16.msra.mxu1 %v1747_v57  ;;  %v1831_v56 = vld [vmem:[%s2417_s3 + $0x78] sm:$0xff]  }
  0x45   : > { %892 = vmatprep.subr.bf16.mxu0 %v1752_v58  ;;  %933 = vmatprep.subr.bf16.mxu1 %v1755_v59  ;;  %v1832_v57 = vld [vmem:[%s2417_s3 + $0x38] sm:$0xff]  }
  0x46   : > { %v1833_v58 = vld [vmem:[%s2417_s3 + $0xb8] sm:$0xff]  }
  0x48   : > { %893 = vmatpush1.bf16.msra.mxu0 %v1750_v60  ;;  %934 = vmatpush1.bf16.msra.mxu1 %v1753_v61 }
  0x49   : > { %894 = vmatprep.subr.bf16.mxu0 %v1758_v62  ;;  %935 = vmatprep.subr.bf16.mxu1 %v1761_v63 }
  0x4c   : > { %895 = vmatpush1.bf16.msra.mxu0 %v1756_v0  ;;  %936 = vmatpush1.bf16.msra.mxu1 %v1759_v1 }
  0x4d   : > { %962 = vmatprep.subr.bf16.mxu0 %v1764_v3  ;;  %1003 = vmatprep.subr.bf16.mxu1 %v1767_v4 }
  0x4f   : > { %913 = vmatmul.mubr.bf16.vlgmr.msra.gmra.mrb[4].mxu0 %v2091_v35  ;;  %954 = vmatmul.mubr.bf16.vlgmr.msra.gmra.mrb[4].mxu1 %v2091_v35 }
  0x50   : > { %963 = vmatpush1.bf16.msra.mxu0 %v1762_v5  ;;  %1004 = vmatpush1.bf16.msra.mxu1 %v1765_v6 }
  0x51   : > { %964 = vmatprep.subr.bf16.mxu0 %v1770_v7  ;;  %1005 = vmatprep.subr.bf16.mxu1 %v1773_v8 }
  0x52   : > { %994 = vmatprep.mubr.bf16.mxu0 %v1898_v2  ;;  %1035 = vmatprep.mubr.bf16.mxu1 %v1898_v2  ;;  %v1783_v2 = vld [vmem:[%s2415_s1 + $0x148] ss:$48 sps:$4 sm:$0xff]  }
  0x54   : > { %965 = vmatpush1.bf16.msra.mxu0 %v1768_v9  ;;  %1006 = vmatpush1.bf16.msra.mxu1 %v1771_v10 }
  0x55   : > { %966 = vmatprep.subr.bf16.mxu0 %v1776_v11  ;;  %1007 = vmatprep.subr.bf16.mxu1 %v1779_v12 }
  0x58   : > { %967 = vmatpush1.bf16.msra.mxu0 %v1774_v13  ;;  %1008 = vmatpush1.bf16.msra.mxu1 %v1777_v14 }
  0x59   : > { %968 = vmatprep.subr.bf16.mxu0 %v1782_v15  ;;  %1009 = vmatprep.subr.bf16.mxu1 %v1785_v16 }
  0x5c   : > { %969 = vmatpush1.bf16.msra.mxu0 %v1780_v17  ;;  %1010 = vmatpush1.bf16.msra.mxu1 %v1783_v2  ;;  %v1055_v17 = vlaneseq }
  0x5d   : > { %970 = vmatprep.subr.bf16.mxu0 %v1788_v18  ;;  %1011 = vmatprep.subr.bf16.mxu1 %v1791_v19  ;;  %v1053_v19 = vld [vmem:[%s2416_s2] sm:$0x7] }
  0x5e   : > { %v1056_v2 = vshrl.u32 %v1055_v17, 7 }
  0x60   : > { %971 = vmatpush1.bf16.msra.mxu0 %v1786_v20  ;;  %1012 = vmatpush1.bf16.msra.mxu1 %v1789_v21  ;;  %v1061_v18 = vsub.s32 1, %v1056_v2  ;;  %v1057_v20 = vsub.s32 0, %v1056_v2  ;;  %v1065_v21 = vsub.s32 2, %v1056_v2 }
  0x61   : > { %972 = vmatprep.subr.bf16.mxu0 %v1794_v22  ;;  %1013 = vmatprep.subr.bf16.mxu1 %v1797_v23 }
  0x62   : > { %v1062_v22 = vrot.slane %v1053_v19, %v1061_v18 }
  0x64   : > { %973 = vmatpush1.bf16.msra.mxu0 %v1792_v24  ;;  %1014 = vmatpush1.bf16.msra.mxu1 %v1795_v25  ;;  %v1058_v25 = vrot.slane %v1053_v19, %v1057_v20 }
  0x65   : > { %974 = vmatprep.subr.bf16.mxu0 %v1800_v26  ;;  %1015 = vmatprep.subr.bf16.mxu1 %v1803_v27 }
  0x68   : > { %975 = vmatpush1.bf16.msra.mxu0 %v1798_v28  ;;  %1016 = vmatpush1.bf16.msra.mxu1 %v1801_v29 }
  0x69   : > { %976 = vmatprep.subr.bf16.mxu0 %v1806_v30  ;;  %1017 = vmatprep.subr.bf16.mxu1 %v1809_v31  ;;  %v1066_v30 = vrot.slane %v1053_v19, %v1065_v21 }
  0x6c   : > { %977 = vmatpush1.bf16.msra.mxu0 %v1804_v32  ;;  %1018 = vmatpush1.bf16.msra.mxu1 %v1807_v33 }
  0x6d   : > { %1602 = vmatprep.subr.bf16.mxu1 %v1899_v38  ;;  %1571 = vmatprep.subr.bf16.mxu0 %v1810_v34 }
  0x6f   : > { %995 = vmatmul.mubr.bf16.vlgmr.msra.gmra.mrb[8].mxu0 %v2091_v35  ;;  %1036 = vmatmul.mubr.bf16.vlgmr.msra.gmra.mrb[8].mxu1 %v2091_v35  ;;  %v1815_v35 = vld [vmem:[%s2417_s3 + $0x88] sm:$0xff]  }
  0x70   : > { %1603 = vmatpush3.bf16.msra.mxu1 %v1812_v37  ;;  %1572 = vmatpush3.bf16.msra.mxu0 %v1811_v36 }
  0x71   : > { %1604 = vmatprep.subr.bf16.mxu1 %v1899_v38  ;;  %1573 = vmatprep.subr.bf16.mxu0 %v1813_v39 }
  0x72   : > { %1618 = vmatprep.mubr.msk.bf16.mxu1 %vm1900_vm0, %v1899_v38 }
  0x74   : > { %1605 = vmatpush3.bf16.msra.mxu1 %v1815_v35  ;;  %1574 = vmatpush3.bf16.msra.mxu0 %v1814_v40 }
  0x75   : > { %1606 = vmatprep.subr.bf16.mxu1 %v1899_v38  ;;  %1575 = vmatprep.subr.bf16.mxu0 %v1816_v41 }
  0x78   : > { %1607 = vmatpush3.bf16.msra.mxu1 %v1818_v42  ;;  %1576 = vmatpush3.bf16.msra.mxu0 %v1817_v43 }
  0x79   : > { %1608 = vmatprep.subr.bf16.mxu1 %v1899_v38  ;;  %1577 = vmatprep.subr.bf16.mxu0 %v1819_v44 }
  0x7c   : > { %1609 = vmatpush3.bf16.msra.mxu1 %v1821_v45  ;;  %1578 = vmatpush3.bf16.msra.mxu0 %v1820_v46 }
  0x7d   : > { %1610 = vmatprep.subr.bf16.mxu1 %v1899_v38  ;;  %1579 = vmatprep.subr.bf16.mxu0 %v1822_v47 }
  0x80   : > { %1611 = vmatpush3.bf16.msra.mxu1 %v1824_v48  ;;  %1580 = vmatpush3.bf16.msra.mxu0 %v1823_v49 }
  0x81   : > { %1612 = vmatprep.subr.bf16.mxu1 %v1899_v38  ;;  %1581 = vmatprep.subr.bf16.mxu0 %v1825_v50 }
  0x84   : > { %1582 = vmatpush3.bf16.msra.mxu0 %v1826_v51  ;;  %1613 = vmatpush3.bf16.msra.mxu1 %v1827_v52 }
  0x85   : > { %1614 = vmatprep.subr.bf16.mxu1 %v1899_v38  ;;  %1583 = vmatprep.subr.bf16.mxu0 %v1828_v53 }
  0x88   : > { %1584 = vmatpush3.bf16.msra.mxu0 %v1829_v54  ;;  %1615 = vmatpush3.bf16.msra.mxu1 %v1830_v55 }
  0x89   : > { %1616 = vmatprep.subr.bf16.mxu1 %v1899_v38  ;;  %1585 = vmatprep.subr.bf16.mxu0 %v1831_v56 }
  0x8c   : > { %1586 = vmatpush3.bf16.msra.mxu0 %v1832_v57  ;;  %1617 = vmatpush3.bf16.msra.mxu1 %v1833_v58  ;;  %v1566_v58 = vld [vmem:[%s2418_s4] ss:$0 sm:$0xff] }
 0x102   : > { %v832_v59 = vpop.f32.mrb[0].mxu0  ;;  %v873_v60 = vpop.f32.mrb[0].mxu1 }
 0x103   : > { %v834_v61 = vpop.f32.mrb[1].mxu0  ;;  %v875_v62 = vpop.f32.mrb[1].mxu1 }
 0x104   : > { %v1044_v63 = vmax.f32 %v832_v59, %v875_v62  ;;  %v836_v0 = vpop.f32.mrb[2].mxu0  ;;  %v877_v1 = vpop.f32.mrb[2].mxu1 }
 0x105   : > { %v837_v3 = vpop.f32.mrb[3].mxu0  ;;  %v878_v4 = vpop.f32.mrb[3].mxu1 }
 0x122   : > { %v914_v5 = vpop.f32.mrb[4].mxu0  ;;  %v955_v6 = vpop.f32.mrb[4].mxu1 }
 0x123   : > { %v1045_v7 = vmax.f32 %v834_v61, %v914_v5  ;;  %v1047_v8 = vmax.f32 %v1044_v63, %v955_v6  ;;  %v916_v9 = vpop.f32.mrb[5].mxu0  ;;  %v957_v10 = vpop.f32.mrb[5].mxu1 }
 0x124   : > { %v1046_v11 = vmax.f32 %v873_v60, %v916_v9  ;;  %v918_v12 = vpop.f32.mrb[6].mxu0  ;;  %v959_v13 = vpop.f32.mrb[6].mxu1 }
 0x125   : > { %v1048_v14 = vmax.f32 %v1045_v7, %v957_v10  ;;  %v919_v15 = vpop.f32.mrb[7].mxu0  ;;  %v960_v16 = vpop.f32.mrb[7].mxu1 }
 0x142   : > { %v996_v23 = vpop.f32.mrb[8].mxu0  ;;  %v1037_v24 = vpop.f32.mrb[8].mxu1 }
 0x143   : > { %v1049_v26 = vmax.f32 %v1046_v11, %v996_v23  ;;  %v1051_v27 = vmax.f32 %v1048_v14, %v1037_v24  ;;  %v998_v28 = vpop.f32.mrb[9].mxu0  ;;  %v1039_v29 = vpop.f32.mrb[9].mxu1 }
 0x144   : > { %v1050_v31 = vmax.f32 %v1047_v8, %v998_v28  ;;  %v1000_v32 = vpop.f32.mrb[10].mxu0  ;;  %v1041_v33 = vpop.f32.mrb[10].mxu1 }
 0x145   : > { %v1071_v34 = vadd.f32 %v1062_v22, %v1051_v27  ;;  %v1052_v36 = vmax.f32 %v1049_v26, %v1039_v29  ;;  %v1001_v37 = vpop.f32.mrb[11].mxu0  ;;  %v1042_v38 = vpop.f32.mrb[11].mxu1 }
 0x146   : > { %v1070_v39 = vadd.f32 %v1058_v25, %v1050_v31 }
 0x147   : > { %v1074_v35 = vmax.f32 %v1071_v34, 0.0  ;;  %v1072_v40 = vadd.f32 %v1066_v30, %v1052_v36 }
 0x148   : > { %v1073_v41 = vmax.f32 %v1070_v39, 0.0 }
 0x149   : > { %v1077_v42 = vpack.c.bf16 %v1074_v35, %v1074_v35  ;;  %v1075_v43 = vmax.f32 %v1072_v40, 0.0 }
 0x14a   : > { %v1076_v44 = vpack.c.bf16 %v1073_v41, %v1073_v41 }
 0x14b   : > { %v1078_v45 = vpack.c.bf16 %v1075_v43, %v1075_v43  ;;  %1303 = vmatprep.mubr.bf16.mxu0 %v1077_v42 }
 0x14c   : > { %1304 = vmatmul.mubr.bf16.vlgmr.msra.gmra.mrb[12].mxu0 %v1076_v44 }
 0x14d   : > { %1619 = vmatmul.mubr.bf16.vlgmr.msra.gmra.mrb[12].mxu1 %v1078_v45 }
 0x21f   : > { %v1587_v46 = vpop.f32.mrb[12].mxu0 }
 0x220   : > { %v1588_v47 = vpop.f32.mrb[13].mxu0  ;;  %v1345_v48 = vpop.f32.mrb[12].mxu1 }
 0x221   : > { %v1589_v49 = vadd.f32 %v1588_v47, %v1587_v46  ;;  %v1590_v50 = vpop.f32.mrb[14].mxu0  ;;  %v1620_v51 = vpop.f32.mrb[13].mxu1 }
 0x222   : > { %v1591_v52 = vpop.f32.mrb[15].mxu0  ;;  %v1348_v53 = vpop.f32.mrb[14].mxu1 }
 0x223   : > { %v1346_v54 = vadd.f32 %v1589_v49, %v1345_v48  ;;  %v1621_v55 = vpop.f32.mrb[15].mxu1 }
 0x225   : > { %1351 = vrot.lane.b32.xlu0 %v1346_v54, %s1901_s12 }
 0x297   : > { %v1352_v56 = vpop.permute.xlu0 %1351 }
 0x298   : > { %v1353_v57 = vmax.f32 %v1346_v54, %v1352_v56 }
 0x29a   : > { %1354 = vrot.lane.b32.xlu0 %v1353_v57, %s1902_s13 }
 0x30c   : > { %v1355_v59 = vpop.permute.xlu0 %1354 }
 0x30d   : > { %v1356_v60 = vmax.f32 %v1353_v57, %v1355_v59 }
 0x30f   : > { %v1364_v61 = vadd.f32 %v1566_v58, %v1356_v60 }
 0x311   : > { %v1365_v62 = vmax.f32 %v1364_v61, 0.0 }
 0x313   : > { %1366 = vst [vmem:[%s215_s25] sm:$0xff] %v1365_v62 }
 0x314   : > { %1847 = shalt.err (!%p1844_p3)
}
 0x315   : > { %s1848_s12 = scalar_lea.hbm %s2372_s8, 128  ;;  %s1852_s14 = scalar_lea.hbm %s2419_s5, 256 }
 0x316   : > { %p1849_p4 = scmp.ne.s32.totalorder %s2372_s8, %s1848_s12  ;;  %p1853_p9 = scmp.lt.u32.totalorder %s2372_s8, %s2419_s5 }
 0x317   : > { %p1854_p10 = scmp.lt.u32.totalorder %s1852_s14, %s1848_s12  ;;  %p1856_p12 = scmp.lt.u32.totalorder %s1848_s12, %s2372_s8 }
 0x318   : > { %p1850_p7 = pnand %p1849_p4, %p1972_p5 }
 0x319   : > { %p1855_p11 = por %p1854_p10, %p1853_p9 }
 0x31a   : > { %p1851_p8 = pneg %p1850_p7 }
 0x31b   : > { %p1857_p13 = por %p1856_p12, %p1855_p11 }
 0x31d   : > { %p1858_p0 = pnand %p1857_p13, %p1851_p8 }
 0x31f   : > { %1861 = shalt.err (!%p1858_p0)
}
 0x320   : > { %1622 = dma.vmem_to_hbm [thread:$0]  (%p1972_p5), %s2374_s26, 128, %s2372_s8, %s1368_s30  }
 0x321 PF: > { %p1628_p1 = scmp.ge.s32.totalorder %s1896_s21, 2  ;;  %s1393_s23 = sand.u32 1, %s1884_s18  }
 0x322   : > { %s1394_s25 = scalar_lea.sflag [#allocation3], %s1393_s23 }
 0x323   : > { %p1625_p2 = pnand %p1628_p1, %p1976_p6 }
 0x325   : > { %1879 = dma.done.wait (!%p1625_p2), %s1394_s25, 128  }
 0x326   : > { %1881 = vsyncadd (!%p1625_p2), %s1394_s25, 4294967168  ;;  %p15_p3 = scmp.ge.s32.totalorder %s1959_s24, 4   ;;  %s2422_s18 = smov %s1888_s19 }
 0x327   : > { %s2423_s19 = smov %s1892_s20  ;;  %s2424_s20 = smov %s1970_s27 }
 0x328   : > { %s2425_s21 = smov %s1959_s24  ;;  %17 = sbr.rel (!%p15_p3) target bundleno = 3 (0x3), region = 75 }
 0x32f   :  { %1399 = vsyncpa [#allocation3], 1 }
 0x330   :  { %1401 = vsyncpa [#allocation3 + $0x1], 1 }

</bundles_post_ra>
